<compile_context>
chip_gen: v5e
topology: v5e:2x2
jax: 0.10.0
libtpu: 0.0.40
codegen_flags: <defaults>
</compile_context>

<pallas_src>
import functools

import jax
import jax.numpy as jnp
from jax import lax
from jax.experimental import pallas as pl
from jax.experimental.pallas import tpu as pltpu


def _moving_avg_kernel(a_ref, x_ref, o_ref, *, bt: int, inv_k: float,
                       n_split: int):
    """out[b] = (A @ x[b]) * inv_k  for b in [0, bt).

    a_ref : (L_out, L)      bf16 tap-count matrix (replicate padding folded in)
    x_ref : (bt, L, Ct)     input block (time on sublanes, channels on lanes)
    o_ref : (bt, L_out, Ct) output block
    """
    a = a_ref[...]  # hoisted: loaded once per grid step, reused for all b

    def body(b, carry):
        r = x_ref[b].astype(jnp.float32)
        acc = jnp.zeros((a.shape[0], r.shape[1]), jnp.float32)
        # Exact f32-accurate matmul via bf16 splitting: x = sum of n_split bf16
        # terms; bf16 x bf16 products are exact and accumulate in f32 on MXU.
        for s_i in range(n_split):
            hi = r.astype(jnp.bfloat16)
            acc = acc + jnp.dot(a, hi, preferred_element_type=jnp.float32)
            if s_i + 1 < n_split:
                r = r - hi.astype(jnp.float32)
        o_ref[b] = (acc * inv_k).astype(o_ref.dtype)
        return carry

    lax.fori_loop(0, bt, body, 0)


def moving_avg(x: jax.Array, kernel_size: int, stride: int) -> jax.Array:
    """x: (B, L, C) -> (B, L_out, C); matches PyTorch MovingAvg.forward."""
    B, L, C = x.shape
    pad = (kernel_size - 1) // 2
    L_pad = L + 2 * pad
    L_out = (L_pad - kernel_size) // stride + 1

    # (L_out, L) tap-count matrix: A[t, j] = #window taps of output row t that
    # land on input index j after replicate-pad clamping. Entries are small
    # integers (<= kernel_size), hence exact in bf16 for kernel_size <= 256.
    t = jnp.arange(L_out, dtype=jnp.int32)
    w = jnp.arange(kernel_size, dtype=jnp.int32)
    src = jnp.clip(t[:, None] * stride + w[None, :] - pad, 0, L - 1)
    rows = jnp.broadcast_to(t[:, None], (L_out, kernel_size))
    a_cnt = (jnp.zeros((L_out, L), jnp.float32)
             .at[rows, src].add(1.0)
             .astype(jnp.bfloat16))

    # ---------------------------- tiling ---------------------------------
    block_budget = 2 * 1024 * 1024        # bytes per x block (Pallas dbl-bufs)
    if C >= 128:
        lane_tile = min(1024, (C // 128) * 128)
        max_lanes = max(128, ((block_budget // (4 * L)) // 128) * 128)
        lane_tile = min(lane_tile, max_lanes)   # multiple of 128; ragged tail OK
    else:
        lane_tile = C                            # full (small) channel dim
    n_lane = pl.cdiv(C, lane_tile)

    per_b = 4 * max(L, L_out) * lane_tile
    bt = max(1, min(B, block_budget // max(per_b, 1)))
    if n_lane == 1 and B > 1:
        bt = min(bt, (B + 1) // 2)               # keep >= 2 parallel grid steps
    n_b = pl.cdiv(B, bt)

    # f32 inputs: 3 exact bf16 passes; bf16 inputs: single pass.
    n_split = 1 if x.dtype == jnp.bfloat16 else 3

    itemsize = jnp.dtype(x.dtype).itemsize
    vmem_est = (2 * bt * L * lane_tile * itemsize        # x blocks (dbl-buffered)
                + 2 * bt * L_out * lane_tile * itemsize  # out blocks
                + 2 * L_out * L * 2                      # A (bf16)
                + 8 * max(L, L_out) * lane_tile * 4)     # in-kernel temporaries
    vmem_limit = int(min(max(32 * 2**20, 2 * vmem_est), 100 * 2**20))

    kernel = functools.partial(_moving_avg_kernel, bt=bt,
                               inv_k=1.0 / kernel_size, n_split=n_split)

    return pl.pallas_call(
        kernel,
        out_shape=jax.ShapeDtypeStruct((B, L_out, C), x.dtype),
        grid_spec=pltpu.PrefetchScalarGridSpec(
            num_scalar_prefetch=0,
            grid=(n_b, n_lane),
            in_specs=[
                pl.BlockSpec((L_out, L), lambda i, j: (0, 0)),   # A, VMEM-resident
                pl.BlockSpec((bt, L, lane_tile), lambda i, j: (i, 0, j)),
            ],
            out_specs=pl.BlockSpec((bt, L_out, lane_tile),
                                   lambda i, j: (i, 0, j)),
        ),
        compiler_params=pltpu.CompilerParams(
            dimension_semantics=("parallel", "parallel"),
            vmem_limit_bytes=vmem_limit,
        ),
    )(a_cnt, x)


def moving_avg_ref(x: jax.Array, kernel_size: int, stride: int) -> jax.Array:
    """Pure-JAX reference mirroring the PyTorch module."""
    pad = (kernel_size - 1) // 2
    front = jnp.repeat(x[:, :1, :], pad, axis=1)
    end = jnp.repeat(x[:, -1:, :], pad, axis=1)
    xp = jnp.concatenate([front, x, end], axis=1)
    L_pad = xp.shape[1]
    L_out = (L_pad - kernel_size) // stride + 1
    idx = (jnp.arange(L_out)[:, None] * stride
           + jnp.arange(kernel_size)[None, :])
    return jnp.mean(xp[:, idx, :], axis=2)


if __name__ == "__main__":
    key = jax.random.PRNGKey(0)
    cases = [
        # (B, L, C, kernel_size, stride)
        (2, 16, 8, 5, 1),      # small, single lane tile
        (80, 48, 8, 25, 1),    # DLinear-style k=25, batch-tiled, grid of 2
        (3, 17, 5, 4, 2),      # ragged batch tile, stride > 1, even kernel
        (2, 24, 256, 7, 1),    # channels >= 128 (lane-tiled path)
    ]
    for i, (B, L, C, k, s) in enumerate(cases):
        key, sub = jax.random.split(key)
        x = jax.random.normal(sub, (B, L, C), dtype=jnp.float32)
        out = jax.block_until_ready(moving_avg(x, k, s))
        ref = moving_avg_ref(x, k, s)
        assert out.shape == ref.shape, (i, out.shape, ref.shape)
        assert jnp.allclose(out, ref, atol=1e-5, rtol=1e-5), (
            f"mismatch case {i}: max err {jnp.max(jnp.abs(out - ref))}")

    print("KERNEL_OK")
</pallas_src>

<mosaic_0001>
module attributes {stable_mosaic.version = 11 : i64} {
  func.func @_moving_avg_kernel(%arg0: i32, %arg1: i32, %arg2: memref<16x16xbf16, #tpu.memory_space<vmem>>, %arg3: memref<1x16x8xf32, #tpu.memory_space<vmem>>, %arg4: memref<1x16x8xf32, #tpu.memory_space<vmem>>) attributes {dimension_semantics = [#tpu.dimension_semantics<parallel>, #tpu.dimension_semantics<parallel>], iteration_bounds = array<i64: 2, 1>, scalar_prefetch = 0 : i64, scratch_operands = 0 : i64, tpu.core_type = #tpu.core_type<tc>, window_params = [{pipeline_mode = #tpu.pipeline_mode<synchronous>, transform_indices = @transform_0, window_bounds = array<i64: 16, 16>}, {transform_indices = @transform_1, window_bounds = array<i64: 1, 16, 8>}, {transform_indices = @transform_2, window_bounds = array<i64: 1, 16, 8>}]} {
    %c0 = arith.constant 0 : index
    %c0_0 = arith.constant 0 : index
    %0 = vector.load %arg2[%c0, %c0_0] : memref<16x16xbf16, #tpu.memory_space<vmem>>, vector<16x16xbf16>
    %c0_i32 = arith.constant 0 : i32
    %1 = arith.index_cast %c0_i32 : i32 to index
    %c0_1 = arith.constant 0 : index
    %c0_2 = arith.constant 0 : index
    %2 = vector.load %arg3[%1, %c0_1, %c0_2] : memref<1x16x8xf32, #tpu.memory_space<vmem>>, vector<1x16x8xf32>
    %3 = vector.shape_cast %2 : vector<1x16x8xf32> to vector<16x8xf32>
    %cst = arith.constant 0.000000e+00 : f32
    %4 = vector.broadcast %cst : f32 to vector<16x8xf32>
    %5 = arith.truncf %3 : vector<16x8xf32> to vector<16x8xbf16>
    %cst_3 = arith.constant dense<0.000000e+00> : vector<16x8xf32>
    %6 = tpu.matmul %0, %5, %cst_3 {dimension_numbers = #tpu.dot_dimension_numbers<[1], [0], [0], [1], [0, 0, 1, 1], [], []>} : vector<16x16xbf16>, vector<16x8xbf16>, vector<16x8xf32> -> vector<16x8xf32>
    %7 = arith.addf %4, %6 : vector<16x8xf32>
    %8 = arith.extf %5 : vector<16x8xbf16> to vector<16x8xf32>
    %9 = arith.subf %3, %8 : vector<16x8xf32>
    %10 = arith.truncf %9 : vector<16x8xf32> to vector<16x8xbf16>
    %cst_4 = arith.constant dense<0.000000e+00> : vector<16x8xf32>
    %11 = tpu.matmul %0, %10, %cst_4 {dimension_numbers = #tpu.dot_dimension_numbers<[1], [0], [0], [1], [0, 0, 1, 1], [], []>} : vector<16x16xbf16>, vector<16x8xbf16>, vector<16x8xf32> -> vector<16x8xf32>
    %12 = arith.addf %7, %11 : vector<16x8xf32>
    %13 = arith.extf %10 : vector<16x8xbf16> to vector<16x8xf32>
    %14 = arith.subf %9, %13 : vector<16x8xf32>
    %15 = arith.truncf %14 : vector<16x8xf32> to vector<16x8xbf16>
    %cst_5 = arith.constant dense<0.000000e+00> : vector<16x8xf32>
    %16 = tpu.matmul %0, %15, %cst_5 {dimension_numbers = #tpu.dot_dimension_numbers<[1], [0], [0], [1], [0, 0, 1, 1], [], []>} : vector<16x16xbf16>, vector<16x8xbf16>, vector<16x8xf32> -> vector<16x8xf32>
    %17 = arith.addf %12, %16 : vector<16x8xf32>
    %cst_6 = arith.constant 2.000000e-01 : f32
    %18 = vector.broadcast %cst_6 : f32 to vector<16x8xf32>
    %19 = arith.mulf %17, %18 : vector<16x8xf32>
    %20 = arith.index_cast %c0_i32 : i32 to index
    %c0_7 = arith.constant 0 : index
    %c0_8 = arith.constant 0 : index
    %21 = vector.load %arg4[%20, %c0_7, %c0_8] : memref<1x16x8xf32, #tpu.memory_space<vmem>>, vector<1x16x8xf32>
    %22 = vector.shape_cast %21 : vector<1x16x8xf32> to vector<16x8xf32>
    %23 = vector.shape_cast %19 : vector<16x8xf32> to vector<1x16x8xf32>
    tpu.vector_store %arg4[%20, %c0_7, %c0_8], %23 {strides = array<i32>} : memref<1x16x8xf32, #tpu.memory_space<vmem>>, vector<1x16x8xf32>,
    %c1_i32 = arith.constant 1 : i32
    return
  }
  func.func @transform_0(%arg0: i32, %arg1: i32) -> (i32, i32) {
    %c0_i32 = arith.constant 0 : i32
    %c0_i32_0 = arith.constant 0 : i32
    %c0_i32_1 = arith.constant 0 : i32
    return %c0_i32, %c0_i32_0 : i32, i32
  }
  func.func @transform_1(%arg0: i32, %arg1: i32) -> (i32, i32, i32) {
    %c0_i32 = arith.constant 0 : i32
    %c0_i32_0 = arith.constant 0 : i32
    return %arg0, %c0_i32, %arg1 : i32, i32, i32
  }
  func.func @transform_2(%arg0: i32, %arg1: i32) -> (i32, i32, i32) {
    %c0_i32 = arith.constant 0 : i32
    %c0_i32_0 = arith.constant 0 : i32
    return %arg0, %c0_i32, %arg1 : i32, i32, i32
  }
}

</mosaic_0001>

<bundles_post_ra>
// kernel: tpu_custom_call.1
= control target key start
LH: loop header
LB: loop body
LE: loop exit
PB: predicated region body
PF: predicated region fallthrough
CT: control target
= control target key end

     0   :  { %s430_s9 = smov 0   ;;  %s432_s10 = smov 0   ;;  %s473_s0 = inlined_call_operand.vmem [shape: bf16[16,16], index: 0, kind: input, shape index: {}]   ;;  %s474_s1 = inlined_call_operand.vmem [shape: f32[2,16,8], index: 1, kind: input, shape index: {}]   ;;  %s475_s2 = inlined_call_operand.vmem [shape: f32[2,16,8], index: 2, kind: output, shape index: {}]  }
   0x1   :  { %s434_s11 = smov 0  }
   0x2 LB: > { %s24_s12 = sadd.s32 1, %s409_s10  ;;  %p350_p0 = scmp.ge.s32.totalorder %s413_s11, 1  ;;  %s413_s11 = sphi %s434_s11, %s12_s11   ;;  %s409_s10 = sphi %s432_s10, %s477_s10   ;;  %s405_s9 = sphi %s430_s9, %s476_s9  }
   0x3   : > { %p26_p1 = scmp.ge.s32.totalorder %s24_s12, 2  ;;  %p131_p2 = scmp.lt.s32.totalorder %s413_s11, 3 }
   0x5   : > { %s479_s12 = smov (%p26_p1, %s24_s12), 0  ;;  %p132_p3 = pnand %p350_p0, %p131_p2 }
   0x6   : > { %p159_p4 = scmp.lt.s32.totalorder (!%p132_p3), %s405_s9, 1 }
   0x7   : > { %135 = sbr.rel (%p132_p3) target bundleno = 178 (0xb2), region = 28 }
   0xc   : > { %s481_s9 = smov (!%p159_p4, %s405_s9), 1  ;;  %v366_v11 = vld [vmem:[%s473_s0] sm:$0xff]  ;;  %vm199_vm0 = vcmask 130048   ;;  %vm260_vm1 = vcmask 64512  }
   0xd   : > { %s364_s13 = sshll.u32 %s481_s9, 4 }
   0xe   : > { %s166_s16 = scalar_lea.vmem %s474_s1, %s364_s13  ;;  %s174_s21 = scalar_lea.vmem %s475_s2, %s364_s13 }
   0xf   : > { %v178_v0 = vld [vmem:[%s166_s16] sm:$0xff]  ;;  %v179_v1 = vld [vmem:[%s166_s16 + $0x8] sm:$0xff] }
  0x10   : > { %v180_v2 = vpack.c.bf16 %v178_v0, %v178_v0  ;;  %v181_v3 = vpack.c.bf16 %v179_v1, %v179_v1 }
  0x12   : > { %v182_v4 = vunpack.c.l.bf16 %v180_v2  ;;  %v183_v5 = vunpack.c.l.bf16 %v181_v3  ;;  %v219_v6 = vunpack.c.l.b16 %v180_v2  ;;  %v220_v7 = vunpack.c.l.b16 %v181_v3 }
  0x14   : > { %v221_v8 = vpack.c.b16 %v220_v7, %v219_v6  ;;  %v184_v9 = vsub.f32 %v178_v0, %v182_v4  ;;  %v185_v10 = vsub.f32 %v179_v1, %v183_v5 }
  0x16   : > { %230 = vmatpush.bf16.msra.mxu1 %v221_v8  ;;  %v186_v12 = vpack.c.bf16 %v184_v9, %v184_v9  ;;  %v187_v13 = vpack.c.bf16 %v185_v10, %v185_v10 }
  0x18   : > { %v195_v14 = vunpack.c.l.b16 %v186_v12  ;;  %v196_v15 = vunpack.c.l.b16 %v187_v13  ;;  %v237_v16 = vunpack.c.l.bf16 %v186_v12  ;;  %v238_v17 = vunpack.c.l.bf16 %v187_v13 }
  0x19   : > { %360 = vmatmul.msk.bf16.vlgmr.msra.gmra.mxu1 %vm199_vm0, %v366_v11 }
  0x1a   : > { %v197_v18 = vpack.c.b16 %v196_v15, %v195_v14  ;;  %v239_v19 = vsub.f32 %v184_v9, %v237_v16  ;;  %v240_v20 = vsub.f32 %v185_v10, %v238_v17 }
  0x1c   : > { %210 = vmatpush.bf16.msra.mxu0 %v197_v18  ;;  %v241_v21 = vpack.c.bf16 %v240_v20, %v239_v19 }
  0x1e   : > { %249 = vmatpush.bf16.msra.mxu2 %v241_v21 }
  0x1f   : > { %359 = vmatmul.msk.bf16.vlgmr.msra.gmra.mxu0 %vm199_vm0, %v366_v11 }
  0x21   : > { %361 = vmatmul.msk.bf16.vlgmr.msra.gmra.mxu2 %vm199_vm0, %v366_v11 }
  0x96   : > { %v232_v23 = vpop.f32.mrf.mxu1 }
  0x9c   : > { %v212_v22 = vpop.f32.mrf.mxu0 }
  0x9d   : > { %v233_v24 = vadd.f32 %v232_v23, %v212_v22 }
  0x9e   : > { %v234_v29 = vpop.f32.mrf.mxu1 }
  0xa4   : > { %v251_v25 = vpop.f32.mrf.mxu2  ;;  %v214_v28 = vpop.f32.mrf.mxu0 }
  0xa5   : > { %v256_v26 = vadd.f32 %v251_v25, %v233_v24  ;;  %v235_v30 = vadd.f32 %v234_v29, %v214_v28 }
  0xa7   : > { %v258_v27 = vmul.f32 0.2, %v256_v26 }
  0xa9   : > { %261 = vst.msk [vmem:[%s174_s21] sm:$0xff] %vm260_vm1, %v258_v27 }
  0xac   : > { %v253_v31 = vpop.f32.mrf.mxu2 }
  0xad   : > { %v257_v32 = vadd.f32 %v253_v31, %v235_v30 }
  0xaf   : > { %v259_v33 = vmul.f32 0.2, %v257_v32 }
  0xb1   : > { %262 = vst.msk [vmem:[%s174_s21 + $0x8] sm:$0xff] %vm260_vm1, %v259_v33 }
  0xb2 PF: > { %s12_s11 = sadd.s32 1, %s413_s11   ;;  %s476_s9 = smov %s409_s10 }
  0xb3   : > { %p9_p5 = scmp.ge.s32.totalorder %s12_s11, 4   ;;  %s477_s10 = smov %s479_s12 }
  0xb5   :  { %11 = sbr.rel (!%p9_p5) target bundleno = 2 (0x2), region = 58 }

</bundles_post_ra>
